<compile_context>
chip_gen: v5e
topology: v5e:2x2
jax: 0.10.0
libtpu: 0.0.40
codegen_flags: <defaults>
</compile_context>

<pallas_src>
import functools

import jax
import jax.numpy as jnp
from jax import lax
from jax.experimental import pallas as pl
from jax.experimental.pallas import tpu as pltpu


def _fused_mlp_kernel(*refs, num_layers, sub, compute_dtype):
    """refs = (x_ref, w0, b0, ..., w_{L-1}, b_{L-1}, o_ref).

    x_ref: [tb, in_dim]   batch rows on sublanes (straight from HBM layout).
    w_l:   [out_l, in_l]  VMEM-resident weight.   b_l: [out_l, 1] f32 bias.
    o_ref: [out_pad, tb]  batch on the lane axis -> lane-dense stores.
    """
    x_ref = refs[0]
    o_ref = refs[-1]
    ws = [refs[1 + 2 * l][...] for l in range(num_layers)]   # tiny, resident
    bs = [refs[2 + 2 * l][...] for l in range(num_layers)]   # [out_l, 1] f32

    tb = x_ref.shape[0]
    num_sub = tb // sub
    # Static sub-chunk loop (== fully-unrolled fori_loop): static 128-aligned
    # slice starts -> unmasked lane-dense stores; each chunk's activation dies
    # at its store, bounding vreg pressure independently of tb.
    for c in range(num_sub):
        start = c * sub
        x_sub = x_ref[pl.ds(start, sub), :].astype(compute_dtype)   # [sub, in]
        # Layer 0: contract the `in` axes of W[out,in] and x[sub,in] -> [out, sub]
        h = lax.dot_general(ws[0], x_sub, (((1,), (1,)), ((), ())),
                            preferred_element_type=jnp.float32)
        h = h + bs[0]                      # (out,1) broadcasts across lanes
        if num_layers > 1:
            h = jnp.maximum(h, 0.0)        # ReLU (f32)
        for l in range(1, num_layers):
            h = jnp.dot(ws[l], h.astype(compute_dtype),
                        preferred_element_type=jnp.float32)
            h = h + bs[l]
            if l != num_layers - 1:
                h = jnp.maximum(h, 0.0)
        o_ref[:, pl.ds(start, sub)] = h.astype(o_ref.dtype)


def _choose_tiles(b128, in_dim, out_pad, x_bytes, *, batch_tile=None,
                  sub_pref=512, max_tile=8192, min_steps=2,
                  act_budget_bytes=24 * 1024 * 1024):
    """Returns (tb, sub). tb = batch (lane) tile, a multiple of sub; sub = the
    in-kernel compute chunk. Both are multiples of 128."""
    if batch_tile is not None:
        tb0 = max(128, (int(batch_tile) // 128) * 128)
    else:
        # Big tiles amortize the ~0.35 us/step grid overhead; keep >= 2 steps
        # when possible so v7x's two TensorCores split the parallel batch axis.
        if b128 >= min_steps * 128:
            tb0 = pl.cdiv(b128 // 128, min_steps) * 128
        else:
            tb0 = b128
        # VMEM cap from the double-buffered x/out blocks (safe for v7x 64 MiB).
        per_col = 2 * (in_dim * x_bytes + out_pad * 4)
        cap = max(128, (act_budget_bytes // per_col) // 128 * 128)
        tb0 = min(tb0, max_tile, cap)
    tb0 = min(tb0, b128)
    sub = min(sub_pref, tb0)
    tb = max(sub, (tb0 // sub) * sub)
    return tb, sub


def init_dqm_params(key, input_dim, hidden_dim, output_dim, depth):
    """torch.nn.Linear-style init. Returns list of (W [out, in], b [out, 1]):
       layer 0: input->hidden, layers 1..depth-1: hidden->hidden, last: hidden->output."""
    dims = [input_dim] + [hidden_dim] * depth + [output_dim]
    params = []
    for i in range(len(dims) - 1):
        fan_in, fan_out = dims[i], dims[i + 1]
        key, kw, kb = jax.random.split(key, 3)
        bound = 1.0 / (fan_in ** 0.5)
        w = jax.random.uniform(kw, (fan_out, fan_in), jnp.float32, -bound, bound)
        b = jax.random.uniform(kb, (fan_out, 1), jnp.float32, -bound, bound)
        params.append((w, b))
    return params


def dqm_forward(params, x, *, compute_dtype=jnp.float32, batch_tile=None,
                sub_tile=512):
    """Forward pass identical to DQM_model.forward, fused into one pallas_call.

    params: list of (W [out, in], b [out, 1]).   x: [batch, input_dim].
    Returns [batch, output_dim].
    """
    B, in_dim = x.shape
    num_layers = len(params)
    out_dim = params[-1][0].shape[0]
    out_pad = pl.cdiv(out_dim, 8) * 8

    # Pad the last layer's rows to a sublane multiple (zero rows, sliced off).
    kparams = list(params)
    if out_pad != out_dim:
        w_l, b_l = kparams[-1]
        kparams[-1] = (jnp.pad(w_l, ((0, out_pad - out_dim), (0, 0))),
                       jnp.pad(b_l, ((0, out_pad - out_dim), (0, 0))))

    # Lane-align the batch only to 128 (no copy when already aligned).
    b128 = pl.cdiv(B, 128) * 128
    xp = x if b128 == B else jnp.pad(x, ((0, b128 - B), (0, 0)))

    tb, sub = _choose_tiles(b128, in_dim, out_pad, x.dtype.itemsize,
                            batch_tile=batch_tile, sub_pref=sub_tile)
    grid = (pl.cdiv(b128, tb),)   # non-dividing last block -> masked writeback

    flat_inputs = [xp]
    in_specs = [pl.BlockSpec((tb, in_dim), lambda i: (i, 0))]
    for w, b in kparams:
        flat_inputs.append(w.astype(compute_dtype))
        flat_inputs.append(b.astype(jnp.float32))   # bias/ReLU stay f32 (v5e path)
        # Whole-array resident blocks, constant index_map -> DMA'd once, reused.
        in_specs.append(pl.BlockSpec(w.shape, lambda i: (0, 0)))
        in_specs.append(pl.BlockSpec(b.shape, lambda i: (0, 0)))

    param_bytes = sum(int(a.size) * a.dtype.itemsize for a in flat_inputs[1:])
    x_blk = tb * in_dim * x.dtype.itemsize
    o_blk = out_pad * tb * x.dtype.itemsize
    # 48 MiB cap leaves headroom for compiler scratch on v7x's 64 MiB VMEM.
    vmem_limit = int(min(48 << 20,
                         max(4 << 20, 2 * (param_bytes + x_blk + o_blk) + (2 << 20))))

    flops = 2 * b128 * sum(w.shape[0] * w.shape[1] for w, _ in kparams)
    bytes_accessed = (int(xp.size) * xp.dtype.itemsize + param_bytes
                      + out_pad * b128 * x.dtype.itemsize)

    kernel = functools.partial(_fused_mlp_kernel, num_layers=num_layers,
                               sub=sub, compute_dtype=compute_dtype)
    out_t = pl.pallas_call(
        kernel,
        out_shape=jax.ShapeDtypeStruct((out_pad, b128), x.dtype),
        grid=grid,
        in_specs=in_specs,
        out_specs=pl.BlockSpec((out_pad, tb), lambda i: (0, i)),
        compiler_params=pltpu.CompilerParams(
            dimension_semantics=("parallel",),
            vmem_limit_bytes=vmem_limit),
        cost_estimate=pl.CostEstimate(flops=flops, transcendentals=0,
                                      bytes_accessed=bytes_accessed),
    )(*flat_inputs)

    return out_t[:out_dim, :B].T


if __name__ == "__main__":
    # Small shapes consistent with the module's forward: x is [batch, input_dim].
    batch, input_dim, hidden_dim, output_dim, depth = 8, 16, 32, 4, 3

    key = jax.random.PRNGKey(0)
    key, kx = jax.random.split(key)
    x = jax.random.normal(kx, (batch, input_dim), jnp.float32)

    params = init_dqm_params(key, input_dim, hidden_dim, output_dim, depth)

    out = dqm_forward(params, x)
    out = jax.block_until_ready(out)

    # Pure-JAX reference (same math, no Pallas).
    ref = x
    n = len(params)
    for i, (w, b) in enumerate(params):
        ref = ref @ w.T + b[:, 0]
        if i != n - 1:
            ref = jnp.maximum(ref, 0.0)

    assert out.shape == (batch, output_dim)
    assert jnp.allclose(out, ref, atol=1e-4, rtol=1e-4), float(
        jnp.max(jnp.abs(out - ref)))

    print("KERNEL_OK")
</pallas_src>

<mosaic_0001>
module attributes {stable_mosaic.version = 11 : i64} {
  func.func @_fused_mlp_kernel(%arg0: i32, %arg1: memref<128x16xf32, #tpu.memory_space<vmem>>, %arg2: memref<32x16xf32, #tpu.memory_space<vmem>>, %arg3: memref<32x1xf32, #tpu.memory_space<vmem>>, %arg4: memref<32x32xf32, #tpu.memory_space<vmem>>, %arg5: memref<32x1xf32, #tpu.memory_space<vmem>>, %arg6: memref<32x32xf32, #tpu.memory_space<vmem>>, %arg7: memref<32x1xf32, #tpu.memory_space<vmem>>, %arg8: memref<8x32xf32, #tpu.memory_space<vmem>>, %arg9: memref<8x1xf32, #tpu.memory_space<vmem>>, %arg10: memref<8x128xf32, #tpu.memory_space<vmem>>) attributes {dimension_semantics = [#tpu.dimension_semantics<parallel>], iteration_bounds = array<i64: 1>, scalar_prefetch = 0 : i64, scratch_operands = 0 : i64, tpu.core_type = #tpu.core_type<tc>, window_params = [{transform_indices = @transform_0, window_bounds = array<i64: 128, 16>}, {pipeline_mode = #tpu.pipeline_mode<synchronous>, transform_indices = @transform_1, window_bounds = array<i64: 32, 16>}, {pipeline_mode = #tpu.pipeline_mode<synchronous>, transform_indices = @transform_2, window_bounds = array<i64: 32, 1>}, {pipeline_mode = #tpu.pipeline_mode<synchronous>, transform_indices = @transform_3, window_bounds = array<i64: 32, 32>}, {pipeline_mode = #tpu.pipeline_mode<synchronous>, transform_indices = @transform_4, window_bounds = array<i64: 32, 1>}, {pipeline_mode = #tpu.pipeline_mode<synchronous>, transform_indices = @transform_5, window_bounds = array<i64: 32, 32>}, {pipeline_mode = #tpu.pipeline_mode<synchronous>, transform_indices = @transform_6, window_bounds = array<i64: 32, 1>}, {pipeline_mode = #tpu.pipeline_mode<synchronous>, transform_indices = @transform_7, window_bounds = array<i64: 8, 32>}, {pipeline_mode = #tpu.pipeline_mode<synchronous>, transform_indices = @transform_8, window_bounds = array<i64: 8, 1>}, {transform_indices = @transform_9, window_bounds = array<i64: 8, 128>}]} {
    %c0 = arith.constant 0 : index
    %c0_0 = arith.constant 0 : index
    %0 = vector.load %arg2[%c0, %c0_0] : memref<32x16xf32, #tpu.memory_space<vmem>>, vector<32x16xf32>
    %c0_1 = arith.constant 0 : index
    %c0_2 = arith.constant 0 : index
    %1 = vector.load %arg4[%c0_1, %c0_2] : memref<32x32xf32, #tpu.memory_space<vmem>>, vector<32x32xf32>
    %c0_3 = arith.constant 0 : index
    %c0_4 = arith.constant 0 : index
    %2 = vector.load %arg6[%c0_3, %c0_4] : memref<32x32xf32, #tpu.memory_space<vmem>>, vector<32x32xf32>
    %c0_5 = arith.constant 0 : index
    %c0_6 = arith.constant 0 : index
    %3 = vector.load %arg8[%c0_5, %c0_6] : memref<8x32xf32, #tpu.memory_space<vmem>>, vector<8x32xf32>
    %c0_7 = arith.constant 0 : index
    %c0_8 = arith.constant 0 : index
    %4 = vector.load %arg3[%c0_7, %c0_8] : memref<32x1xf32, #tpu.memory_space<vmem>>, vector<32x1xf32>
    %c0_9 = arith.constant 0 : index
    %c0_10 = arith.constant 0 : index
    %5 = vector.load %arg5[%c0_9, %c0_10] : memref<32x1xf32, #tpu.memory_space<vmem>>, vector<32x1xf32>
    %c0_11 = arith.constant 0 : index
    %c0_12 = arith.constant 0 : index
    %6 = vector.load %arg7[%c0_11, %c0_12] : memref<32x1xf32, #tpu.memory_space<vmem>>, vector<32x1xf32>
    %c0_13 = arith.constant 0 : index
    %c0_14 = arith.constant 0 : index
    %7 = vector.load %arg9[%c0_13, %c0_14] : memref<8x1xf32, #tpu.memory_space<vmem>>, vector<8x1xf32>
    %c0_15 = arith.constant 0 : index
    %c0_16 = arith.constant 0 : index
    %8 = vector.load %arg1[%c0_15, %c0_16] : memref<128x16xf32, #tpu.memory_space<vmem>>, vector<128x16xf32>
    %cst = arith.constant dense<0.000000e+00> : vector<32x128xf32>
    %9 = tpu.matmul %0, %8, %cst {dimension_numbers = #tpu.dot_dimension_numbers<[1], [1], [0], [0], [0, 0, 1, 0], [], []>} : vector<32x16xf32>, vector<128x16xf32>, vector<32x128xf32> -> vector<32x128xf32>
    %10 = vector.broadcast %4 : vector<32x1xf32> to vector<32x128xf32>
    %11 = arith.addf %9, %10 : vector<32x128xf32>
    %cst_17 = arith.constant 0.000000e+00 : f32
    %12 = vector.broadcast %cst_17 : f32 to vector<32x128xf32>
    %13 = arith.maximumf %11, %12 : vector<32x128xf32>
    %cst_18 = arith.constant dense<0.000000e+00> : vector<32x128xf32>
    %14 = tpu.matmul %1, %13, %cst_18 {dimension_numbers = #tpu.dot_dimension_numbers<[1], [0], [0], [1], [0, 0, 1, 1], [], []>} : vector<32x32xf32>, vector<32x128xf32>, vector<32x128xf32> -> vector<32x128xf32>
    %15 = vector.broadcast %5 : vector<32x1xf32> to vector<32x128xf32>
    %16 = arith.addf %14, %15 : vector<32x128xf32>
    %cst_19 = arith.constant 0.000000e+00 : f32
    %17 = vector.broadcast %cst_19 : f32 to vector<32x128xf32>
    %18 = arith.maximumf %16, %17 : vector<32x128xf32>
    %cst_20 = arith.constant dense<0.000000e+00> : vector<32x128xf32>
    %19 = tpu.matmul %2, %18, %cst_20 {dimension_numbers = #tpu.dot_dimension_numbers<[1], [0], [0], [1], [0, 0, 1, 1], [], []>} : vector<32x32xf32>, vector<32x128xf32>, vector<32x128xf32> -> vector<32x128xf32>
    %20 = vector.broadcast %6 : vector<32x1xf32> to vector<32x128xf32>
    %21 = arith.addf %19, %20 : vector<32x128xf32>
    %cst_21 = arith.constant 0.000000e+00 : f32
    %22 = vector.broadcast %cst_21 : f32 to vector<32x128xf32>
    %23 = arith.maximumf %21, %22 : vector<32x128xf32>
    %cst_22 = arith.constant dense<0.000000e+00> : vector<8x128xf32>
    %24 = tpu.matmul %3, %23, %cst_22 {dimension_numbers = #tpu.dot_dimension_numbers<[1], [0], [0], [1], [0, 0, 1, 1], [], []>} : vector<8x32xf32>, vector<32x128xf32>, vector<8x128xf32> -> vector<8x128xf32>
    %25 = vector.broadcast %7 : vector<8x1xf32> to vector<8x128xf32>
    %26 = arith.addf %24, %25 : vector<8x128xf32>
    %c0_23 = arith.constant 0 : index
    %c0_24 = arith.constant 0 : index
    %27 = vector.load %arg10[%c0_23, %c0_24] : memref<8x128xf32, #tpu.memory_space<vmem>>, vector<8x128xf32>
    tpu.vector_store %arg10[%c0_23, %c0_24], %26 {strides = array<i32>} : memref<8x128xf32, #tpu.memory_space<vmem>>, vector<8x128xf32>,
    return
  }
  func.func @transform_0(%arg0: i32) -> (i32, i32) {
    %c0_i32 = arith.constant 0 : i32
    %c0_i32_0 = arith.constant 0 : i32
    return %arg0, %c0_i32 : i32, i32
  }
  func.func @transform_1(%arg0: i32) -> (i32, i32) {
    %c0_i32 = arith.constant 0 : i32
    %c0_i32_0 = arith.constant 0 : i32
    %c0_i32_1 = arith.constant 0 : i32
    return %c0_i32, %c0_i32_0 : i32, i32
  }
  func.func @transform_2(%arg0: i32) -> (i32, i32) {
    %c0_i32 = arith.constant 0 : i32
    %c0_i32_0 = arith.constant 0 : i32
    %c0_i32_1 = arith.constant 0 : i32
    return %c0_i32, %c0_i32_0 : i32, i32
  }
  func.func @transform_3(%arg0: i32) -> (i32, i32) {
    %c0_i32 = arith.constant 0 : i32
    %c0_i32_0 = arith.constant 0 : i32
    %c0_i32_1 = arith.constant 0 : i32
    return %c0_i32, %c0_i32_0 : i32, i32
  }
  func.func @transform_4(%arg0: i32) -> (i32, i32) {
    %c0_i32 = arith.constant 0 : i32
    %c0_i32_0 = arith.constant 0 : i32
    %c0_i32_1 = arith.constant 0 : i32
    return %c0_i32, %c0_i32_0 : i32, i32
  }
  func.func @transform_5(%arg0: i32) -> (i32, i32) {
    %c0_i32 = arith.constant 0 : i32
    %c0_i32_0 = arith.constant 0 : i32
    %c0_i32_1 = arith.constant 0 : i32
    return %c0_i32, %c0_i32_0 : i32, i32
  }
  func.func @transform_6(%arg0: i32) -> (i32, i32) {
    %c0_i32 = arith.constant 0 : i32
    %c0_i32_0 = arith.constant 0 : i32
    %c0_i32_1 = arith.constant 0 : i32
    return %c0_i32, %c0_i32_0 : i32, i32
  }
  func.func @transform_7(%arg0: i32) -> (i32, i32) {
    %c0_i32 = arith.constant 0 : i32
    %c0_i32_0 = arith.constant 0 : i32
    %c0_i32_1 = arith.constant 0 : i32
    return %c0_i32, %c0_i32_0 : i32, i32
  }
  func.func @transform_8(%arg0: i32) -> (i32, i32) {
    %c0_i32 = arith.constant 0 : i32
    %c0_i32_0 = arith.constant 0 : i32
    %c0_i32_1 = arith.constant 0 : i32
    return %c0_i32, %c0_i32_0 : i32, i32
  }
  func.func @transform_9(%arg0: i32) -> (i32, i32) {
    %c0_i32 = arith.constant 0 : i32
    %c0_i32_0 = arith.constant 0 : i32
    return %c0_i32, %arg0 : i32, i32
  }
}

</mosaic_0001>

<bundles_post_ra>
// kernel: tpu_custom_call.1
= control target key start
LH: loop header
LB: loop body
LE: loop exit
PB: predicated region body
PF: predicated region fallthrough
CT: control target
= control target key end

     0   :  { %vm95_vm0 = vcmask 130048   ;;  %s635_s0 = inlined_call_operand.vmem [shape: f32[128,16], index: 0, kind: input, shape index: {}]   ;;  %s636_s1 = inlined_call_operand.vmem [shape: f32[32,16], index: 1, kind: input, shape index: {}]   ;;  %s637_s2 = inlined_call_operand.vmem [shape: f32[32,1], index: 2, kind: input, shape index: {}]   ;;  %s638_s3 = inlined_call_operand.vmem [shape: f32[32,32], index: 3, kind: input, shape index: {}]   ;;  %s639_s4 = inlined_call_operand.vmem [shape: f32[32,1], index: 4, kind: input, shape index: {}]   ;;  %s640_s5 = inlined_call_operand.vmem [shape: f32[32,32], index: 5, kind: input, shape index: {}]   ;;  %s641_s6 = inlined_call_operand.vmem [shape: f32[32,1], index: 6, kind: input, shape index: {}]   ;;  %s642_s7 = inlined_call_operand.vmem [shape: f32[8,32], index: 7, kind: input, shape index: {}]   ;;  %s643_s8 = inlined_call_operand.vmem [shape: f32[8,1], index: 8, kind: input, shape index: {}]   ;;  %s644_s9 = inlined_call_operand.hbm [shape: f32[8,128], index: 9, kind: output, shape index: {}]  }
   0x1   :  { %v74_v0 = vld [vmem:[%s635_s0 + $0x78] sm:$0xff]  ;;  %v73_v1 = vld [vmem:[%s635_s0 + $0x70] sm:$0xff] }
   0x2   :  { %365 = vmatpush.xpose.msk.msra.mxu0 %vm95_vm0, %v74_v0 }
   0x3   :  { %14 = vsyncpa [#allocation3], 0  ;;  %v72_v2 = vld [vmem:[%s635_s0 + $0x68] sm:$0xff]  ;;  %v71_v3 = vld [vmem:[%s635_s0 + $0x60] sm:$0xff]  ;;  %v425_v8 = vmov 0   ;;  %vm209_vm1 = vcmask 261120  }
   0x4   :  { %v70_v4 = vld [vmem:[%s635_s0 + $0x58] sm:$0xff]  ;;  %v69_v5 = vld [vmem:[%s635_s0 + $0x50] sm:$0xff]  ;;  %v68_v6 = vld [vmem:[%s635_s0 + $0x48] sm:$0xff]  ;;  %396 = vset.pattern.permute.xlu0 %v425_v8  ;;  %397 = vset.pattern.permute.xlu1 %v425_v8  ;;  %s426_s19 = smov [#allocation2]   ;;  %s356_s23 = sshll.u32 %s644_s9, 4  ;;  %s357_s23 = int_to_ptr.hbm [resolvable:$true] %s356_s23 }
   0x5   :  { %v67_v7 = vld [vmem:[%s635_s0 + $0x40] sm:$0xff]  ;;  %398 = vset.pattern.permute.xlu2 %v425_v8  ;;  %v49_v9 = vld [vmem:[%s637_s2 + $0x18] sm:$0xff]  ;;  %v47_v11 = vld [vmem:[%s637_s2 + $0x8] sm:$0xff]  ;;  %s354_s20 = sshll.u32 %s426_s19, 4  ;;  %s355_s20 = int_to_ptr.vmem [resolvable:$true] %s354_s20 }
   0x6   :  { %366 = vmatpush.xpose.msk.msra.mxu0 %vm95_vm0, %v73_v1  ;;  %92 = vperm.xlu0 %396, %v49_v9   ;;  %v66_v10 = vld [vmem:[%s635_s0 + $0x38] sm:$0xff]  ;;  %v65_v12 = vld [vmem:[%s635_s0 + $0x30] sm:$0xff]  ;;  %v64_v14 = vld [vmem:[%s635_s0 + $0x28] sm:$0xff] }
   0x7   :  { %82 = vperm.xlu1 %397, %v47_v11   ;;  %v48_v13 = vld [vmem:[%s637_s2 + $0x10] sm:$0xff]  ;;  %v46_v15 = vld [vmem:[%s637_s2] sm:$0xff]  ;;  %v51_v17 = vld [vmem:[%s639_s4 + $0x8] sm:$0xff] }
   0x8   :  { %v63_v16 = vld [vmem:[%s635_s0 + $0x20] sm:$0xff]  ;;  %v62_v18 = vld [vmem:[%s635_s0 + $0x18] sm:$0xff]  ;;  %v61_v19 = vld [vmem:[%s635_s0 + $0x10] sm:$0xff] }
   0x9   :  { %v56_v20 = vld [vmem:[%s641_s6 + $0x10] sm:$0xff]  ;;  %v60_v21 = vld [vmem:[%s635_s0 + $0x8] sm:$0xff]  ;;  %v50_v22 = vld [vmem:[%s639_s4] sm:$0xff] }
   0xa   :  { %367 = vmatpush.xpose.msk.msra.mxu0 %vm95_vm0, %v72_v2  ;;  %v59_v23 = vld [vmem:[%s635_s0] sm:$0xff]  ;;  %v55_v26 = vld [vmem:[%s641_s6 + $0x8] sm:$0xff]  ;;  %v35_v28 = vld [vmem:[%s636_s1 + $0x10] sm:$0xff] }
   0xb   :  { %v58_v24 = vld [vmem:[%s643_s8] sm:$0xff]  ;;  %v34_v27 = vld [vmem:[%s636_s1 + $0x8] sm:$0xff]  ;;  %v36_v29 = vld [vmem:[%s636_s1 + $0x18] sm:$0xff] }
   0xc   :  { %v33_v25 = vld [vmem:[%s636_s1] sm:$0xff]  ;;  %v53_v42 = vld [vmem:[%s639_s4 + $0x18] sm:$0xff]  ;;  %v52_v48 = vld [vmem:[%s639_s4 + $0x10] sm:$0xff] }
   0xd   :  { %206 = vperm.xlu2 %398, %v53_v42   ;;  %v37_v47 = vld [vmem:[%s638_s3] sm:$0xff]  ;;  %v38_v49 = vld [vmem:[%s638_s3 + $0x8] sm:$0xff]  ;;  %v57_v50 = vld [vmem:[%s641_s6 + $0x18] sm:$0xff] }
   0xe   :  { %368 = vmatpush.xpose.msk.msra.mxu0 %vm95_vm0, %v71_v3  ;;  %87 = vperm.xlu0 %396, %v48_v13   ;;  %v39_v51 = vld [vmem:[%s638_s3 + $0x10] sm:$0xff]  ;;  %v54_v52 = vld [vmem:[%s641_s6] sm:$0xff]  ;;  %v40_v53 = vld [vmem:[%s638_s3 + $0x18] sm:$0xff] }
   0xf   :  { %77 = vperm.xlu1 %397, %v46_v15   ;;  %v43_v8 = vld [vmem:[%s640_s5 + $0x10] sm:$0xff]  ;;  %v44_v9 = vld [vmem:[%s640_s5 + $0x18] sm:$0xff] }
  0x12   :  { %369 = vmatpush.xpose.msk.msra.mxu0 %vm95_vm0, %v70_v4 }
  0x15   :  { %201 = vperm.xlu2 %398, %v52_v48  }
  0x16   :  { %370 = vmatpush.xpose.msk.msra.mxu0 %vm95_vm0, %v69_v5  ;;  %196 = vperm.xlu0 %396, %v51_v17  }
  0x17   :  { %191 = vperm.xlu1 %397, %v50_v22  }
  0x1a   :  { %371 = vmatpush.xpose.msk.msra.mxu0 %vm95_vm0, %v68_v6  ;;  %v41_v6 = vld [vmem:[%s640_s5] sm:$0xff] }
  0x1d   :  { %272 = vperm.xlu2 %398, %v57_v50  }
  0x1e   :  { %372 = vmatpush.xpose.msk.msra.mxu0 %vm95_vm0, %v67_v7  ;;  %267 = vperm.xlu0 %396, %v56_v20   ;;  %v42_v7 = vld [vmem:[%s640_s5 + $0x8] sm:$0xff] }
  0x1f   :  { %262 = vperm.xlu1 %397, %v55_v26   ;;  %v45_v26 = vld [vmem:[%s642_s7] sm:$0xff] }
  0x22   :  { %373 = vmatpush.xpose.msk.msra.mxu0 %vm95_vm0, %v66_v10 }
  0x25   :  { %257 = vperm.xlu2 %398, %v54_v52  }
  0x26   :  { %374 = vmatpush.xpose.msk.msra.mxu0 %vm95_vm0, %v65_v12  ;;  %322 = vperm.xlu0 %396, %v58_v24  }
  0x2a   :  { %375 = vmatpush.xpose.msk.msra.mxu0 %vm95_vm0, %v64_v14 }
  0x2e   :  { %376 = vmatpush.xpose.msk.msra.mxu0 %vm95_vm0, %v63_v16 }
  0x32   :  { %377 = vmatpush.xpose.msk.msra.mxu0 %vm95_vm0, %v62_v18 }
  0x36   :  { %378 = vmatpush.xpose.msk.msra.mxu0 %vm95_vm0, %v61_v19 }
  0x3a   :  { %379 = vmatpush.xpose.msk.msra.mxu0 %vm95_vm0, %v60_v21 }
  0x3e   :  { %380 = vmatpush.xpose.msk.msra.mxu0 %vm95_vm0, %v59_v23 }
  0x41   :  { %381 = vmatmul.msk.f32.vlgmr.msra.gmra.mxu0 %vm95_vm0, %v33_v25 }
  0x49   :  { %382 = vmatmul.msk.f32.gmra.mxu0 %vm95_vm0, %v34_v27 }
  0x51   :  { %383 = vmatmul.msk.f32.gmra.mxu0 %vm95_vm0, %v35_v28 }
  0x59   :  { %384 = vmatmul.msk.f32.gmra.mxu0 %vm95_vm0, %v36_v29 }
  0x67   :  { %v207_v56 = vpop.permute.xlu2 %206 }
  0x6f   :  { %v202_v58 = vpop.permute.xlu2 %201 }
  0x77   :  { %v273_v13 = vpop.permute.xlu2 %272 }
  0x78   :  { %v93_v32 = vpop.permute.xlu0 %92 }
  0x79   :  { %v83_v33 = vpop.permute.xlu1 %82 }
  0x7f   :  { %v258_v21 = vpop.permute.xlu2 %257 }
  0x80   :  { %v88_v35 = vpop.permute.xlu0 %87 }
  0x81   :  { %v78_v39 = vpop.permute.xlu1 %77 }
  0x88   :  { %v197_v62 = vpop.permute.xlu0 %196 }
  0x89   :  { %v192_v1 = vpop.permute.xlu1 %191 }
  0x90   :  { %v268_v14 = vpop.permute.xlu0 %267 }
  0x91   :  { %v263_v18 = vpop.permute.xlu1 %262 }
  0x98   :  { %v323_v27 = vpop.permute.xlu0 %322 }
  0xbe   :  { %v173_v30 = vpop.f32.mrf.mxu0 }
  0xbf   :  { %v174_v43 = vadd.f32 %v173_v30, %v78_v39 }
  0xc1   :  { %v185_v46 = vmax.f32 %v174_v43, 0.0 }
  0xc6   :  { %v176_v31 = vpop.f32.mrf.mxu0 }
  0xc7   :  { %v177_v40 = vadd.f32 %v176_v31, %v83_v33 }
  0xc9   :  { %v186_v45 = vmax.f32 %v177_v40, 0.0 }
  0xce   :  { %v179_v34 = vpop.f32.mrf.mxu0 }
  0xcf   :  { %v180_v37 = vadd.f32 %v179_v34, %v88_v35 }
  0xd1   :  { %v187_v44 = vmax.f32 %v180_v37, 0.0 }
  0xd6   :  { %v182_v36 = vpop.f32.mrf.mxu0 }
  0xd7   :  { %v183_v38 = vadd.f32 %v182_v36, %v93_v32 }
  0xd9   :  { %v188_v41 = vmax.f32 %v183_v38, 0.0 }
  0xdb   :  { %234 = vmatpush.msra.mxu1 %v188_v41 }
  0xdd   :  { %235 = vmatpush.msra.mxu1 %v187_v44 }
  0xdf   :  { %236 = vmatpush.msra.mxu1 %v186_v45 }
  0xe1   :  { %237 = vmatpush.msra.mxu1 %v185_v46 }
  0xe2   :  { %385 = vmatmul.msk.f32.vlgmr.msra.gmra.mxu1 %vm209_vm1, %v37_v47 }
  0xea   :  { %386 = vmatmul.msk.f32.gmra.mxu1 %vm209_vm1, %v38_v49 }
  0xf2   :  { %387 = vmatmul.msk.f32.gmra.mxu1 %vm209_vm1, %v39_v51 }
  0xfa   :  { %388 = vmatmul.msk.f32.gmra.mxu1 %vm209_vm1, %v40_v53 }
 0x15f   :  { %v239_v54 = vpop.f32.mrf.mxu1 }
 0x160   :  { %v240_v2 = vadd.f32 %v239_v54, %v192_v1 }
 0x162   :  { %v251_v5 = vmax.f32 %v240_v2, 0.0 }
 0x167   :  { %v242_v55 = vpop.f32.mrf.mxu1 }
 0x168   :  { %v243_v63 = vadd.f32 %v242_v55, %v197_v62 }
 0x16a   :  { %v252_v4 = vmax.f32 %v243_v63, 0.0 }
 0x16f   :  { %v245_v57 = vpop.f32.mrf.mxu1 }
 0x170   :  { %v246_v60 = vadd.f32 %v245_v57, %v202_v58 }
 0x172   :  { %v253_v3 = vmax.f32 %v246_v60, 0.0 }
 0x177   :  { %v248_v59 = vpop.f32.mrf.mxu1 }
 0x178   :  { %v249_v61 = vadd.f32 %v248_v59, %v207_v56 }
 0x17a   :  { %v254_v0 = vmax.f32 %v249_v61, 0.0 }
 0x17c   :  { %299 = vmatpush.msra.mxu2 %v254_v0 }
 0x17e   :  { %300 = vmatpush.msra.mxu2 %v253_v3 }
 0x180   :  { %301 = vmatpush.msra.mxu2 %v252_v4 }
 0x182   :  { %302 = vmatpush.msra.mxu2 %v251_v5 }
 0x183   :  { %389 = vmatmul.msk.f32.vlgmr.msra.gmra.mxu2 %vm209_vm1, %v41_v6 }
 0x18b   :  { %390 = vmatmul.msk.f32.gmra.mxu2 %vm209_vm1, %v42_v7 }
 0x193   :  { %391 = vmatmul.msk.f32.gmra.mxu2 %vm209_vm1, %v43_v8 }
 0x19b   :  { %392 = vmatmul.msk.f32.gmra.mxu2 %vm209_vm1, %v44_v9 }
 0x206   :  { %v304_v10 = vpop.f32.mrf.mxu2 }
 0x207   :  { %v305_v22 = vadd.f32 %v304_v10, %v258_v21 }
 0x209   :  { %v316_v25 = vmax.f32 %v305_v22, 0.0 }
 0x20e   :  { %v307_v11 = vpop.f32.mrf.mxu2 }
 0x20f   :  { %v308_v19 = vadd.f32 %v307_v11, %v263_v18 }
 0x211   :  { %v317_v24 = vmax.f32 %v308_v19, 0.0 }
 0x216   :  { %v310_v12 = vpop.f32.mrf.mxu2 }
 0x217   :  { %v311_v16 = vadd.f32 %v310_v12, %v268_v14 }
 0x219   :  { %v318_v23 = vmax.f32 %v311_v16, 0.0 }
 0x21e   :  { %v313_v15 = vpop.f32.mrf.mxu2 }
 0x21f   :  { %v314_v17 = vadd.f32 %v313_v15, %v273_v13 }
 0x221   :  { %v319_v20 = vmax.f32 %v314_v17, 0.0 }
 0x223   :  { %340 = vmatpush.msra.mxu3 %v319_v20 }
 0x225   :  { %341 = vmatpush.msra.mxu3 %v318_v23 }
 0x227   :  { %342 = vmatpush.msra.mxu3 %v317_v24 }
 0x229   :  { %343 = vmatpush.msra.mxu3 %v316_v25 }
 0x22a   :  { %393 = vmatmul.msk.f32.vlgmr.msra.gmra.mxu3 %vm209_vm1, %v45_v26 }
 0x2ad   :  { %v345_v28 = vpop.f32.mrf.mxu3 }
 0x2ae   :  { %v346_v29 = vadd.f32 %v345_v28, %v323_v27 }
 0x2b0   :  { %348 = vst [vmem:[#allocation2] sm:$0xff] %v346_v29 }
 0x2b1   :  { %359 = dma.vmem_to_hbm [thread:$0]  %s355_s20, 128, %s357_s23, [#allocation3]  }
 0x2b2   :  { %423 = dma.done.wait [#allocation3], 128  }
 0x2b3   :  { %424 = vsyncadd [#allocation3], 4294967168 }
 0x2b4   :  { %364 = vsyncpa [#allocation3], 1 }

</bundles_post_ra>
